<compile_context>
chip_gen: v6e
topology: v6e:2x2x1
jax: 0.10.0
libtpu: 0.0.40
codegen_flags: <defaults>
</compile_context>

<pallas_src>
import jax
import jax.numpy as jnp
from jax.experimental import pallas as pl
from jax.experimental.pallas import tpu as pltpu


def _fnn_kernel(x_ref, w1t_ref, b1_ref, w2t_ref, b2_ref, o_ref):
    # x_ref  : (TB, 20)  current batch tile (rows past B in the last tile are
    #                    garbage; their outputs are dropped on writeback)
    # w1t_ref: (20, 32)  hidden weight, (in, out) layout, VMEM-resident
    # b1_ref : (1, 32)   hidden bias, VMEM-resident
    # w2t_ref: (32, 1)   output weight, (in, out) layout, VMEM-resident
    # b2_ref : (1, 1)    output bias, SMEM scalar
    # o_ref  : (TB, 1)   output tile
    h = jnp.dot(x_ref[...], w1t_ref[...], preferred_element_type=jnp.float32)
    h = jnp.maximum(h + b1_ref[...], 0.0)                        # (TB, 32)
    y = jnp.dot(h, w2t_ref[...], preferred_element_type=jnp.float32)
    o_ref[...] = (y + b2_ref[0, 0]).astype(o_ref.dtype)          # (TB, 1)


def _round_up(n, m):
    return ((n + m - 1) // m) * m


def fnn_forward(x, w1, b1, w2, b2, *, tb_max=8192):
    """Forward pass of Net.

    x : (B, 20) float32
    w1: (32, 20) float32   (torch nn.Linear(20, 32).weight layout)
    b1: (32,)    float32
    w2: (1, 32)  float32   (torch nn.Linear(32, 1).weight layout)
    b2: (1,)     float32
    returns (B, 1) float32
    """
    B, K = x.shape
    H = w1.shape[0]   # 32
    O = w2.shape[0]   # 1

    # Batch tile: multiple of 128, big enough to amortize per-step overhead,
    # but keep ~4+ blocks on large batches so v7x's two TensorCores both get
    # work along the "parallel" batch axis.  No padding of x: the final block
    # may be partial (Pallas clamps the boundary DMAs).
    TB = max(128, min(tb_max, _round_up(-(-B // 4), 128)))
    num_blocks = pl.cdiv(B, TB)

    # Pre-transpose the tiny weights once to (in, out) so both in-kernel
    # matmuls are plain A @ B (no per-tile transpose of the big batch tile).
    w1t = w1.T.astype(jnp.float32)                 # (20, 32)
    w2t = w2.T.astype(jnp.float32)                 # (32, 1)
    b1r = b1.reshape(1, H).astype(jnp.float32)     # (1, 32)
    b2s = b2.reshape(1, 1).astype(jnp.float32)     # (1, 1) SMEM scalar

    # Lane-padded VMEM footprint: x and out blocks each occupy TB*512 B
    # (20 / 1 lanes pad to 128), double-buffered -> 4 * TB * 512 B total.
    vmem_bytes = int(min(48 << 20, max(16 << 20, 4 * TB * 512 + (2 << 20))))

    flops = 2 * B * (K * H + H * O)
    bytes_accessed = 4 * (B * K + B * O + K * H + H + H * O + O)

    out = pl.pallas_call(
        _fnn_kernel,
        out_shape=jax.ShapeDtypeStruct((B, O), jnp.float32),
        grid=(num_blocks,),
        in_specs=[
            pl.BlockSpec((TB, K), lambda i: (i, 0)),            # x: streamed tiles
            pl.BlockSpec((K, H), lambda i: (0, 0)),             # W1^T: resident
            pl.BlockSpec((1, H), lambda i: (0, 0)),             # b1: resident
            pl.BlockSpec((H, O), lambda i: (0, 0)),             # W2^T: resident
            pl.BlockSpec(memory_space=pltpu.MemorySpace.SMEM),  # b2: SMEM scalar
        ],
        out_specs=pl.BlockSpec((TB, O), lambda i: (i, 0)),      # (B, 1) directly
        compiler_params=pltpu.CompilerParams(
            dimension_semantics=("parallel",),
            vmem_limit_bytes=vmem_bytes,
        ),
        cost_estimate=pl.CostEstimate(
            flops=flops, transcendentals=0, bytes_accessed=bytes_accessed),
    )(x.astype(jnp.float32), w1t, b1r, w2t, b2s)
    return out


def init_params(key):
    """Deterministic init mimicking PyTorch nn.Linear default (U[-1/sqrt(fan_in), +]).

    Weights are stored in torch's native (out_features, in_features) layout.
    """
    k1, k2, k3, k4 = jax.random.split(key, 4)
    fan_in1, fan_in2 = 20, 32
    bound1 = 1.0 / jnp.sqrt(fan_in1)
    bound2 = 1.0 / jnp.sqrt(fan_in2)
    w1 = jax.random.uniform(k1, (32, 20), jnp.float32, -bound1, bound1)
    b1 = jax.random.uniform(k2, (32,), jnp.float32, -bound1, bound1)
    w2 = jax.random.uniform(k3, (1, 32), jnp.float32, -bound2, bound2)
    b2 = jax.random.uniform(k4, (1,), jnp.float32, -bound2, bound2)
    return w1, b1, w2, b2


if __name__ == "__main__":
    key = jax.random.PRNGKey(0)
    kx, kp = jax.random.split(key)
    w1, b1, w2, b2 = init_params(kp)

    # Small single-tile case + a multi-block case whose final block is partial
    # (exercises the no-padding / clamped-boundary path).
    for B in (8, 1000):
        x = jax.random.normal(jax.random.fold_in(kx, B), (B, 20), jnp.float32)
        out = jax.block_until_ready(fnn_forward(x, w1, b1, w2, b2))

        # pure-JAX reference (same math as the PyTorch module)
        ref = jnp.maximum(x @ w1.T + b1, 0.0) @ w2.T + b2
        assert out.shape == (B, 1)
        assert jnp.allclose(out, ref, atol=1e-5, rtol=1e-5), B

    print("KERNEL_OK")
</pallas_src>

<mosaic_0001>
module attributes {stable_mosaic.version = 11 : i64} {
  func.func @_fnn_kernel(%arg0: i32, %arg1: memref<128x20xf32, #tpu.memory_space<vmem>>, %arg2: memref<20x32xf32, #tpu.memory_space<vmem>>, %arg3: memref<1x32xf32, #tpu.memory_space<vmem>>, %arg4: memref<32x1xf32, #tpu.memory_space<vmem>>, %arg5: memref<1x1xf32, #tpu.memory_space<smem>>, %arg6: memref<128x1xf32, #tpu.memory_space<vmem>>) attributes {dimension_semantics = [#tpu.dimension_semantics<parallel>], iteration_bounds = array<i64: 1>, scalar_prefetch = 0 : i64, scratch_operands = 0 : i64, tpu.core_type = #tpu.core_type<tc>, window_params = [{transform_indices = @transform_0, window_bounds = array<i64: 128, 20>}, {pipeline_mode = #tpu.pipeline_mode<synchronous>, transform_indices = @transform_1, window_bounds = array<i64: 20, 32>}, {pipeline_mode = #tpu.pipeline_mode<synchronous>, transform_indices = @transform_2, window_bounds = array<i64: 1, 32>}, {pipeline_mode = #tpu.pipeline_mode<synchronous>, transform_indices = @transform_3, window_bounds = array<i64: 32, 1>}, {transform_indices = @transform_4, window_bounds = array<i64: 1, 1>}, {transform_indices = @transform_5, window_bounds = array<i64: 128, 1>}]} {
    %c0 = arith.constant 0 : index
    %c0_0 = arith.constant 0 : index
    %0 = vector.load %arg1[%c0, %c0_0] : memref<128x20xf32, #tpu.memory_space<vmem>>, vector<128x20xf32>
    %c0_1 = arith.constant 0 : index
    %c0_2 = arith.constant 0 : index
    %1 = vector.load %arg2[%c0_1, %c0_2] : memref<20x32xf32, #tpu.memory_space<vmem>>, vector<20x32xf32>
    %cst = arith.constant dense<0.000000e+00> : vector<128x32xf32>
    %2 = tpu.matmul %0, %1, %cst {dimension_numbers = #tpu.dot_dimension_numbers<[1], [0], [0], [1], [0, 0, 1, 1], [], []>} : vector<128x20xf32>, vector<20x32xf32>, vector<128x32xf32> -> vector<128x32xf32>
    %c0_3 = arith.constant 0 : index
    %c0_4 = arith.constant 0 : index
    %3 = vector.load %arg3[%c0_3, %c0_4] : memref<1x32xf32, #tpu.memory_space<vmem>>, vector<1x32xf32>
    %4 = vector.broadcast %3 : vector<1x32xf32> to vector<128x32xf32>
    %5 = arith.addf %2, %4 : vector<128x32xf32>
    %cst_5 = arith.constant 0.000000e+00 : f32
    %6 = vector.broadcast %cst_5 : f32 to vector<128x32xf32>
    %7 = arith.maximumf %5, %6 : vector<128x32xf32>
    %c0_6 = arith.constant 0 : index
    %c0_7 = arith.constant 0 : index
    %8 = vector.load %arg4[%c0_6, %c0_7] : memref<32x1xf32, #tpu.memory_space<vmem>>, vector<32x1xf32>
    %cst_8 = arith.constant dense<0.000000e+00> : vector<128x1xf32>
    %9 = tpu.matmul %7, %8, %cst_8 {dimension_numbers = #tpu.dot_dimension_numbers<[1], [0], [0], [1], [0, 0, 1, 1], [], []>} : vector<128x32xf32>, vector<32x1xf32>, vector<128x1xf32> -> vector<128x1xf32>
    %c0_9 = arith.constant 0 : index
    %c0_10 = arith.constant 0 : index
    %10 = memref.load %arg5[%c0_9, %c0_10] : memref<1x1xf32, #tpu.memory_space<smem>>
    %11 = vector.broadcast %10 : f32 to vector<128x1xf32>
    %12 = arith.addf %9, %11 : vector<128x1xf32>
    %c0_11 = arith.constant 0 : index
    %c0_12 = arith.constant 0 : index
    %13 = vector.load %arg6[%c0_11, %c0_12] : memref<128x1xf32, #tpu.memory_space<vmem>>, vector<128x1xf32>
    tpu.vector_store %arg6[%c0_11, %c0_12], %12 {strides = array<i32>} : memref<128x1xf32, #tpu.memory_space<vmem>>, vector<128x1xf32>,
    return
  }
  func.func @transform_0(%arg0: i32) -> (i32, i32) {
    %c0_i32 = arith.constant 0 : i32
    %c0_i32_0 = arith.constant 0 : i32
    return %arg0, %c0_i32 : i32, i32
  }
  func.func @transform_1(%arg0: i32) -> (i32, i32) {
    %c0_i32 = arith.constant 0 : i32
    %c0_i32_0 = arith.constant 0 : i32
    %c0_i32_1 = arith.constant 0 : i32
    return %c0_i32, %c0_i32_0 : i32, i32
  }
  func.func @transform_2(%arg0: i32) -> (i32, i32) {
    %c0_i32 = arith.constant 0 : i32
    %c0_i32_0 = arith.constant 0 : i32
    %c0_i32_1 = arith.constant 0 : i32
    return %c0_i32, %c0_i32_0 : i32, i32
  }
  func.func @transform_3(%arg0: i32) -> (i32, i32) {
    %c0_i32 = arith.constant 0 : i32
    %c0_i32_0 = arith.constant 0 : i32
    %c0_i32_1 = arith.constant 0 : i32
    return %c0_i32, %c0_i32_0 : i32, i32
  }
  func.func @transform_4(%arg0: i32) -> (i32, i32) {
    %c0_i32 = arith.constant 0 : i32
    %c0_i32_0 = arith.constant 0 : i32
    %c0_i32_1 = arith.constant 0 : i32
    return %c0_i32, %c0_i32_0 : i32, i32
  }
  func.func @transform_5(%arg0: i32) -> (i32, i32) {
    %c0_i32 = arith.constant 0 : i32
    %c0_i32_0 = arith.constant 0 : i32
    return %arg0, %c0_i32 : i32, i32
  }
}

</mosaic_0001>

<bundles_post_ra>
// kernel: tpu_custom_call.1
= control target key start
LH: loop header
LB: loop body
LE: loop exit
PB: predicated region body
PF: predicated region fallthrough
CT: control target
= control target key end

     0   :  { %vm96_vm0 = vcmask 1043456   ;;  %vm47_vm1 = vcmask 162816   ;;  %vm267_vm2 = vcmask 261120   ;;  %vm461_vm3 = vcmask 7168   ;;  %s794_s0 = inlined_call_operand.vmem [shape: f32[8,20], index: 0, kind: input, shape index: {}]   ;;  %s795_s1 = inlined_call_operand.vmem [shape: f32[20,32], index: 1, kind: input, shape index: {}]   ;;  %s796_s2 = inlined_call_operand.vmem [shape: f32[1,32], index: 2, kind: input, shape index: {}]   ;;  %s797_s3 = inlined_call_operand.vmem [shape: f32[32,1], index: 3, kind: input, shape index: {}]   ;;  %s798_s4 = inlined_call_operand.<no memory space> [shape: f32[1,1], index: 4, kind: input, shape index: {}]   ;;  %s799_s5 = inlined_call_operand.vmem [shape: f32[8,1], index: 5, kind: output, shape index: {}]  }
   0x1   :  { %v39_v0 = vld [vmem:[%s795_s1 + $0x10] sm:$0xf]  ;;  %v38_v1 = vld [vmem:[%s795_s1 + $0x8] sm:$0xff]  ;;  %v21_v2 = vld [vmem:[%s794_s0] sm:$0xff] }
   0x2   :  { %592 = vmatprep.subr.msk.mxu0 %vm96_vm0, %v39_v0  ;;  %v37_v3 = vld [vmem:[%s795_s1] sm:$0xff]  ;;  %598 = vmatprep.mubr.msk.f32.mxu0 %vm47_vm1, %v21_v2  ;;  %v22_v4 = vld [vmem:[%s794_s0 + $0x8] sm:$0xff]  ;;  %v23_v5 = vld [vmem:[%s794_s0 + $0x10] sm:$0xff] }
   0x3   :  { %593 = vmatpush3.msk.msra.mxu0 %vm96_vm0, %v39_v0  ;;  %v24_v6 = vld [vmem:[%s794_s0 + $0x18] sm:$0xff]  ;;  %v25_v7 = vld [vmem:[%s794_s0 + $0x20] sm:$0xff]  ;;  %v26_v8 = vld [vmem:[%s794_s0 + $0x28] sm:$0xff] }
   0x4   :  { %594 = vmatprep.subr.mxu0 %v38_v1  ;;  %v27_v9 = vld [vmem:[%s794_s0 + $0x30] sm:$0xff]  ;;  %v28_v10 = vld [vmem:[%s794_s0 + $0x38] sm:$0xff]  ;;  %v29_v11 = vld [vmem:[%s794_s0 + $0x40] sm:$0xff] }
   0x5   :  { %595 = vmatpush3.msra.mxu0 %v38_v1  ;;  %v30_v12 = vld [vmem:[%s794_s0 + $0x48] sm:$0xff]  ;;  %v31_v13 = vld [vmem:[%s794_s0 + $0x50] sm:$0xff]  ;;  %v32_v14 = vld [vmem:[%s794_s0 + $0x58] sm:$0xff] }
   0x6   :  { %596 = vmatprep.subr.mxu0 %v37_v3  ;;  %v33_v15 = vld [vmem:[%s794_s0 + $0x60] sm:$0xff]  ;;  %v34_v16 = vld [vmem:[%s794_s0 + $0x68] sm:$0xff]  ;;  %v35_v17 = vld [vmem:[%s794_s0 + $0x70] sm:$0xff] }
   0x7   :  { %597 = vmatpush3.msra.mxu0 %v37_v3  ;;  %v36_v18 = vld [vmem:[%s794_s0 + $0x78] sm:$0xff]  ;;  %v263_v20 = vld [vmem:[%s797_s3 + $0x10] sm:$0xff]  ;;  %v262_v21 = vld [vmem:[%s797_s3 + $0x8] sm:$0xff] }
   0x8   :  { %599 = vmatmul.mubr.msk.f32.vlgmr.msra.gmra.mxu0 %vm47_vm1, %v22_v4  ;;  %v264_v19 = vld [vmem:[%s797_s3 + $0x18] sm:$0xff]  ;;  %v261_v22 = vld [vmem:[%s797_s3] sm:$0xff] }
   0x9   :  { %601 = vmatprep.mubr.msk.f32.mxu0 %vm47_vm1, %v23_v5  ;;  %622 = vmatprep.subr.mxu1 %v264_v19  ;;  %v519_v23 = vld [vmem:[%s796_s2] ss:$0 sm:$0xff] }
   0xa   :  { %623 = vmatpush3.msra.mxu1 %v264_v19 }
   0xb   :  { %624 = vmatprep.subr.mxu1 %v263_v20 }
   0xc   :  { %602 = vmatmul.mubr.msk.f32.gmra.mxu0 %vm47_vm1, %v24_v6  ;;  %625 = vmatpush3.msra.mxu1 %v263_v20 }
   0xd   :  { %604 = vmatprep.mubr.msk.f32.mxu0 %vm47_vm1, %v25_v7  ;;  %626 = vmatprep.subr.mxu1 %v262_v21 }
   0xe   :  { %627 = vmatpush3.msra.mxu1 %v262_v21 }
   0xf   :  { %628 = vmatprep.subr.mxu1 %v261_v22 }
  0x10   :  { %605 = vmatmul.mubr.msk.f32.gmra.mxu0 %vm47_vm1, %v26_v8  ;;  %629 = vmatpush3.msra.mxu1 %v261_v22  ;;  %v266_v8 = vstv %s798_s4 }
  0x11   :  { %607 = vmatprep.mubr.msk.f32.mxu0 %vm47_vm1, %v27_v9 }
  0x14   :  { %608 = vmatmul.mubr.msk.f32.gmra.mxu0 %vm47_vm1, %v28_v10 }
  0x15   :  { %610 = vmatprep.mubr.msk.f32.mxu0 %vm47_vm1, %v29_v11 }
  0x18   :  { %611 = vmatmul.mubr.msk.f32.gmra.mxu0 %vm47_vm1, %v30_v12 }
  0x19   :  { %613 = vmatprep.mubr.msk.f32.mxu0 %vm47_vm1, %v31_v13 }
  0x1c   :  { %614 = vmatmul.mubr.msk.f32.gmra.mxu0 %vm47_vm1, %v32_v14 }
  0x1d   :  { %616 = vmatprep.mubr.msk.f32.mxu0 %vm47_vm1, %v33_v15 }
  0x20   :  { %617 = vmatmul.mubr.msk.f32.gmra.mxu0 %vm47_vm1, %v34_v16 }
  0x21   :  { %619 = vmatprep.mubr.msk.f32.mxu0 %vm47_vm1, %v35_v17 }
  0x24   :  { %620 = vmatmul.mubr.msk.f32.gmra.mxu0 %vm47_vm1, %v36_v18 }
  0xc8   :  { %v600_v24 = vpop.f32.mrf.mxu0 }
  0xc9   :  { %v172_v25 = vadd.f32 %v600_v24, %v519_v23 }
  0xca   :  { %v166_v26 = vpop.f32.mrf.mxu0 }
  0xcb   :  { %v167_v27 = vadd.f32 %v519_v23, %v166_v26  ;;  %v246_v30 = vmax.f32 %v172_v25, 0.0 }
  0xcc   :  { %v603_v28 = vpop.f32.mrf.mxu0 }
  0xcd   :  { %v245_v29 = vmax.f32 %v167_v27, 0.0  ;;  %v182_v31 = vadd.f32 %v603_v28, %v519_v23 }
  0xce   :  { %v176_v32 = vpop.f32.mrf.mxu0 }
  0xcf   :  { %v177_v33 = vadd.f32 %v519_v23, %v176_v32  ;;  %630 = vmatprep.mubr.msk.f32.mxu1 %vm267_vm2, %v245_v29  ;;  %v248_v36 = vmax.f32 %v182_v31, 0.0 }
  0xd0   :  { %v606_v34 = vpop.f32.mrf.mxu0  ;;  %631 = vmatmul.mubr.msk.f32.vlgmr.msra.gmra.mxu1 %vm267_vm2, %v246_v30 }
  0xd1   :  { %v247_v35 = vmax.f32 %v177_v33, 0.0  ;;  %v192_v37 = vadd.f32 %v606_v34, %v519_v23 }
  0xd2   :  { %v186_v38 = vpop.f32.mrf.mxu0 }
  0xd3   :  { %v187_v39 = vadd.f32 %v519_v23, %v186_v38  ;;  %633 = vmatprep.mubr.msk.f32.mxu1 %vm267_vm2, %v247_v35  ;;  %v250_v42 = vmax.f32 %v192_v37, 0.0 }
  0xd4   :  { %v609_v40 = vpop.f32.mrf.mxu0  ;;  %634 = vmatmul.mubr.msk.f32.gmra.mxu1 %vm267_vm2, %v248_v36 }
  0xd5   :  { %v249_v41 = vmax.f32 %v187_v39, 0.0  ;;  %v202_v43 = vadd.f32 %v609_v40, %v519_v23 }
  0xd6   :  { %v196_v44 = vpop.f32.mrf.mxu0 }
  0xd7   :  { %v197_v45 = vadd.f32 %v519_v23, %v196_v44  ;;  %636 = vmatprep.mubr.msk.f32.mxu1 %vm267_vm2, %v249_v41  ;;  %v252_v48 = vmax.f32 %v202_v43, 0.0 }
  0xd8   :  { %v612_v46 = vpop.f32.mrf.mxu0  ;;  %637 = vmatmul.mubr.msk.f32.gmra.mxu1 %vm267_vm2, %v250_v42 }
  0xd9   :  { %v251_v47 = vmax.f32 %v197_v45, 0.0  ;;  %v212_v49 = vadd.f32 %v612_v46, %v519_v23 }
  0xda   :  { %v206_v50 = vpop.f32.mrf.mxu0 }
  0xdb   :  { %v207_v51 = vadd.f32 %v519_v23, %v206_v50  ;;  %639 = vmatprep.mubr.msk.f32.mxu1 %vm267_vm2, %v251_v47  ;;  %v254_v54 = vmax.f32 %v212_v49, 0.0 }
  0xdc   :  { %v615_v52 = vpop.f32.mrf.mxu0  ;;  %640 = vmatmul.mubr.msk.f32.gmra.mxu1 %vm267_vm2, %v252_v48 }
  0xdd   :  { %v253_v53 = vmax.f32 %v207_v51, 0.0  ;;  %v222_v55 = vadd.f32 %v615_v52, %v519_v23 }
  0xde   :  { %v216_v56 = vpop.f32.mrf.mxu0 }
  0xdf   :  { %v217_v57 = vadd.f32 %v519_v23, %v216_v56  ;;  %642 = vmatprep.mubr.msk.f32.mxu1 %vm267_vm2, %v253_v53  ;;  %v256_v60 = vmax.f32 %v222_v55, 0.0 }
  0xe0   :  { %v618_v58 = vpop.f32.mrf.mxu0  ;;  %643 = vmatmul.mubr.msk.f32.gmra.mxu1 %vm267_vm2, %v254_v54 }
  0xe1   :  { %v255_v59 = vmax.f32 %v217_v57, 0.0  ;;  %v232_v61 = vadd.f32 %v618_v58, %v519_v23 }
  0xe2   :  { %v226_v62 = vpop.f32.mrf.mxu0 }
  0xe3   :  { %v227_v63 = vadd.f32 %v519_v23, %v226_v62  ;;  %645 = vmatprep.mubr.msk.f32.mxu1 %vm267_vm2, %v255_v59  ;;  %v258_v2 = vmax.f32 %v232_v61, 0.0 }
  0xe4   :  { %v621_v0 = vpop.f32.mrf.mxu0  ;;  %646 = vmatmul.mubr.msk.f32.gmra.mxu1 %vm267_vm2, %v256_v60 }
  0xe5   :  { %v257_v1 = vmax.f32 %v227_v63, 0.0  ;;  %v242_v3 = vadd.f32 %v621_v0, %v519_v23 }
  0xe6   :  { %v236_v4 = vpop.f32.mrf.mxu0 }
  0xe7   :  { %v237_v5 = vadd.f32 %v519_v23, %v236_v4  ;;  %648 = vmatprep.mubr.msk.f32.mxu1 %vm267_vm2, %v257_v1  ;;  %v260_v7 = vmax.f32 %v242_v3, 0.0 }
  0xe8   :  { %649 = vmatmul.mubr.msk.f32.gmra.mxu1 %vm267_vm2, %v258_v2 }
  0xe9   :  { %v259_v6 = vmax.f32 %v237_v5, 0.0 }
  0xeb   :  { %651 = vmatprep.mubr.msk.f32.mxu1 %vm267_vm2, %v259_v6 }
  0xec   :  { %652 = vmatmul.mubr.msk.f32.gmra.mxu1 %vm267_vm2, %v260_v7 }
 0x190   :  { %v632_v9 = vpop.f32.mrf.mxu1 }
 0x192   :  { %v382_v10 = vpop.f32.mrf.mxu1 }
 0x193   :  { %v383_v11 = vadd.f32 %v382_v10, %v266_v8 }
 0x194   :  { %v635_v12 = vpop.f32.mrf.mxu1 }
 0x195   :  { %462 = vst.msk [vmem:[#allocation3] sm:$0xff] %vm461_vm3, %v383_v11 }
 0x196   :  { %v392_v13 = vpop.f32.mrf.mxu1 }
 0x198   :  { %v638_v14 = vpop.f32.mrf.mxu1 }
 0x19a   :  { %v402_v15 = vpop.f32.mrf.mxu1 }
 0x19c   :  { %v508_v16 = vld [vmem:[#allocation3] sm:$0xff]  ;;  %v641_v17 = vpop.f32.mrf.mxu1 }
 0x19d   :  { %509 = vst [vmem:[%s799_s5] sm:$0xff] %v508_v16 }
 0x19e   :  { %v412_v18 = vpop.f32.mrf.mxu1 }
 0x1a0   :  { %v644_v19 = vpop.f32.mrf.mxu1 }
 0x1a2   :  { %v422_v20 = vpop.f32.mrf.mxu1 }
 0x1a4   :  { %v647_v21 = vpop.f32.mrf.mxu1 }
 0x1a6   :  { %v432_v22 = vpop.f32.mrf.mxu1 }
 0x1a8   :  { %v650_v23 = vpop.f32.mrf.mxu1 }
 0x1aa   :  { %v442_v24 = vpop.f32.mrf.mxu1 }
 0x1ac   :  { %v653_v25 = vpop.f32.mrf.mxu1 }
 0x1ae   :  { %v452_v26 = vpop.f32.mrf.mxu1 }

</bundles_post_ra>
